<compile_context>
chip_gen: v5e
topology: v5e:2x2
jax: 0.10.0
libtpu: 0.0.40
codegen_flags: <defaults>
</compile_context>

<pallas_src>
import jax
import jax.numpy as jnp
from jax.experimental import pallas as pl
from jax.experimental.pallas import tpu as pltpu


def _hard_sigmoid_kernel(x_ref, o_ref):
    x = x_ref[...]
    # relu6(x + 3) / 6, computed in the input dtype (constants are weak-typed).
    y = jnp.clip(x + 3.0, 0.0, 6.0) * (1.0 / 6.0)
    if y.dtype != o_ref.dtype:
        y = y.astype(o_ref.dtype)
    o_ref[...] = y


def hard_sigmoid(x, *, donate=False):
    """Elementwise HardSigmoid via Pallas. Works on any float shape/dtype."""
    orig_shape = x.shape
    dtype = x.dtype
    n = x.size
    if n == 0:
        return x

    x_flat = x.reshape(-1)

    # Single pad only when n is not a multiple of 128 (rare); otherwise zero copies.
    pad = (-n) % 128
    if pad:
        x_flat = jnp.pad(x_flat, (0, pad))
    total = n + pad

    # Widest lane dim (multiple of 128) dividing the flat size -> lane-dense,
    # unmasked stores and fewer grid steps.
    lane = 128
    for cand in (2048, 1024, 512, 256):
        if total % cand == 0:
            lane = cand
            break
    rows = total // lane

    # ~4 MiB blocks: 2x(in) + 2x(out) double buffering is ~16 MiB, under the
    # 32 MiB scoped-VMEM limit we request below (safe on v5e/v6e/v7x).
    bytes_per_row = lane * jnp.dtype(dtype).itemsize
    target_rows = max(8, ((4 * 1024 * 1024) // bytes_per_row) // 8 * 8)
    if rows <= target_rows:
        block_rows = rows            # full rows dim -> always a legal block
    else:
        block_rows = target_rows     # multiple of 8; partial last block via grid

    x2d = x_flat.reshape(rows, lane)
    grid = (pl.cdiv(rows, block_rows),)

    out2d = pl.pallas_call(
        _hard_sigmoid_kernel,
        out_shape=jax.ShapeDtypeStruct((rows, lane), dtype),
        grid_spec=pltpu.PrefetchScalarGridSpec(
            num_scalar_prefetch=0,
            grid=grid,
            in_specs=[pl.BlockSpec((block_rows, lane), lambda i: (i, 0))],
            out_specs=pl.BlockSpec((block_rows, lane), lambda i: (i, 0)),
        ),
        compiler_params=pltpu.CompilerParams(
            dimension_semantics=("parallel",),
            vmem_limit_bytes=32 * 1024 * 1024,
        ),
        input_output_aliases=({0: 0} if donate else {}),
    )(x2d)

    if pad:
        return out2d.reshape(-1)[:n].reshape(orig_shape)
    return out2d.reshape(orig_shape)


if __name__ == "__main__":
    key = jax.random.PRNGKey(0)

    # NCHW input, matching a typical conv-activation use of HardSigmoid.
    x = jax.random.normal(key, (2, 4, 16, 16), dtype=jnp.float32) * 4.0
    y = jax.block_until_ready(hard_sigmoid(x))
    y_ref = jnp.clip(x + 3.0, 0.0, 6.0) / 6.0
    assert y.shape == x.shape and y.dtype == x.dtype
    assert jnp.allclose(y, y_ref, atol=1e-6), "mismatch vs reference (f32)"

    # Pad path (size not a multiple of 128) + bf16 dtype.
    x2 = (jax.random.normal(key, (3, 5, 7), dtype=jnp.float32) * 4.0).astype(jnp.bfloat16)
    y2 = jax.block_until_ready(hard_sigmoid(x2))
    y2_ref = jnp.clip(x2 + 3.0, 0.0, 6.0) / 6.0
    assert y2.shape == x2.shape and y2.dtype == x2.dtype
    assert jnp.allclose(y2.astype(jnp.float32), y2_ref.astype(jnp.float32), atol=1e-2)

    # Donated-input path (mirrors PyTorch inplace=True).
    x3 = jax.random.normal(key, (2, 4, 16, 16), dtype=jnp.float32) * 4.0
    y3 = jax.block_until_ready(hard_sigmoid(x3, donate=True))
    y3_ref = jnp.clip(x3 + 3.0, 0.0, 6.0) / 6.0
    assert jnp.allclose(y3, y3_ref, atol=1e-6)

    print("KERNEL_OK")
</pallas_src>

<mosaic_0001>
module attributes {stable_mosaic.version = 11 : i64} {
  func.func @_hard_sigmoid_kernel(%arg0: i32, %arg1: memref<1x2048xf32, #tpu.memory_space<vmem>>, %arg2: memref<1x2048xf32, #tpu.memory_space<vmem>>) attributes {dimension_semantics = [#tpu.dimension_semantics<parallel>], iteration_bounds = array<i64: 1>, scalar_prefetch = 0 : i64, scratch_operands = 0 : i64, tpu.core_type = #tpu.core_type<tc>, window_params = [{transform_indices = @transform_0, window_bounds = array<i64: 1, 2048>}, {transform_indices = @transform_1, window_bounds = array<i64: 1, 2048>}]} {
    %c0 = arith.constant 0 : index
    %c0_0 = arith.constant 0 : index
    %0 = vector.load %arg1[%c0, %c0_0] : memref<1x2048xf32, #tpu.memory_space<vmem>>, vector<1x2048xf32>
    %cst = arith.constant 3.000000e+00 : f32
    %1 = vector.broadcast %cst : f32 to vector<1x2048xf32>
    %2 = arith.addf %0, %1 : vector<1x2048xf32>
    %cst_1 = arith.constant 0.000000e+00 : f32
    %cst_2 = arith.constant 6.000000e+00 : f32
    %3 = vector.broadcast %cst_1 : f32 to vector<1x2048xf32>
    %4 = arith.maximumf %3, %2 : vector<1x2048xf32>
    %5 = vector.broadcast %cst_2 : f32 to vector<1x2048xf32>
    %6 = arith.minimumf %5, %4 : vector<1x2048xf32>
    %cst_3 = arith.constant 0.166666672 : f32
    %7 = vector.broadcast %cst_3 : f32 to vector<1x2048xf32>
    %8 = arith.mulf %6, %7 : vector<1x2048xf32>
    %c0_4 = arith.constant 0 : index
    %c0_5 = arith.constant 0 : index
    %9 = vector.load %arg2[%c0_4, %c0_5] : memref<1x2048xf32, #tpu.memory_space<vmem>>, vector<1x2048xf32>
    tpu.vector_store %arg2[%c0_4, %c0_5], %8 {strides = array<i32>} : memref<1x2048xf32, #tpu.memory_space<vmem>>, vector<1x2048xf32>,
    return
  }
  func.func @transform_0(%arg0: i32) -> (i32, i32) {
    %c0_i32 = arith.constant 0 : i32
    %c0_i32_0 = arith.constant 0 : i32
    return %arg0, %c0_i32 : i32, i32
  }
  func.func @transform_1(%arg0: i32) -> (i32, i32) {
    %c0_i32 = arith.constant 0 : i32
    %c0_i32_0 = arith.constant 0 : i32
    return %arg0, %c0_i32 : i32, i32
  }
}

</mosaic_0001>

<bundles_post_ra>
// kernel: tpu_custom_call.1
= control target key start
LH: loop header
LB: loop body
LE: loop exit
PB: predicated region body
PF: predicated region fallthrough
CT: control target
= control target key end

     0   :  { %6 = vsyncpa [#allocation3], 0  ;;  %s124_s0 = inlined_call_operand.hbm [shape: f32[1,2048], index: 0, kind: input, shape index: {}]   ;;  %s125_s1 = inlined_call_operand.hbm [shape: f32[1,2048], index: 1, kind: output, shape index: {}]  }
   0x1   :  { %7 = vsyncpa [#allocation4], 0  ;;  %s13_s8 = sshll.u32 %s124_s0, 4  ;;  %s106_s9 = smov [#allocation2]   ;;  %s14_s8 = int_to_ptr.hbm [resolvable:$true] %s13_s8 }
   0x2   :  { %s15_s10 = sshll.u32 %s106_s9, 4  ;;  %s16_s10 = int_to_ptr.vmem [resolvable:$true] %s15_s10 }
   0x3   :  { %18 = dma.hbm_to_vmem [thread:$0]  %s14_s8, 256, %s16_s10, [#allocation3]  }
   0x4   :  { %102 = dma.done.wait [#allocation3], 256  }
   0x5   :  { %103 = vsyncadd [#allocation3], 4294967040  ;;  %v23_v0 = vld [vmem:[#allocation2] sm:$0xff]  ;;  %v24_v1 = vld [vmem:[#allocation2 + $0x8] sm:$0xff]  ;;  %s107_s11 = smov [#allocation5]   ;;  %s42_s0 = sshll.u32 %s125_s1, 4  ;;  %s43_s0 = int_to_ptr.hbm [resolvable:$true] %s42_s0 }
   0x6   :  { %v25_v2 = vadd.f32 3.0, %v23_v0  ;;  %v26_v3 = vadd.f32 3.0, %v24_v1  ;;  %s40_s12 = sshll.u32 %s107_s11, 4  ;;  %s41_s12 = int_to_ptr.vmem [resolvable:$true] %s40_s12 }
   0x8   :  { %v27_v4 = vmax.f32 %v25_v2, 0.0  ;;  %v28_v5 = vmax.f32 %v26_v3, 0.0 }
   0xa   :  { %v29_v6 = vmin.f32 %v27_v4, 6.0  ;;  %v30_v7 = vmin.f32 %v28_v5, 6.0 }
   0xc   :  { %v31_v8 = vmul.f32 0.16666667, %v29_v6  ;;  %v32_v9 = vmul.f32 0.16666667, %v30_v7 }
   0xe   :  { %33 = vst [vmem:[#allocation5] sm:$0xff] %v31_v8 }
   0xf   :  { %34 = vst [vmem:[#allocation5 + $0x8] sm:$0xff] %v32_v9 }
  0x10   :  { %45 = dma.vmem_to_hbm [thread:$0]  %s41_s12, 256, %s43_s0, [#allocation4]  }
  0x11   :  { %104 = dma.done.wait [#allocation4], 256  }
  0x12   :  { %105 = vsyncadd [#allocation4], 4294967040 }
  0x13   :  { %50 = vsyncpa [#allocation3], 1 }
  0x14   :  { %51 = vsyncpa [#allocation4], 1 }

</bundles_post_ra>
